<compile_context>
chip_gen: v7x
topology: tpu7x:2x2x1
jax: 0.10.0
libtpu: 0.0.40
codegen_flags: <defaults>
</compile_context>

<pallas_src>
import jax
import jax.numpy as jnp
import numpy as np
from jax import lax
from jax.experimental import pallas as pl
from jax.experimental.pallas import tpu as pltpu


# -----------------------------------------------------------------------------
# Pallas kernel: conv as one block-Toeplitz matmul + ReLU + 3-layer MLP.
# -----------------------------------------------------------------------------
def critic_kernel(x_ref, cw_ref, wt_ref, cb_ref, w1a_ref, w1b_ref, b1_ref,
                  w2_ref, b2_ref, w3_ref, b3_ref, out_ref):
    f32 = jnp.float32
    bf16 = jnp.bfloat16

    # Conv2d(C, 32, (5, A)) + bias + ReLU, all T windows in one MXU pass:
    # x tile is already bf16 and (w, c, a)-flattened, wt is block-Toeplitz.
    conv = jnp.dot(x_ref[...], wt_ref[...],
                   preferred_element_type=f32) + cb_ref[...]      # (bt, T*32) f32
    conv = jnp.maximum(conv, 0.0)

    # Linear(T*32 + A, 256): torch.cat folded into split weights.
    h1 = (jnp.dot(conv.astype(bf16), w1a_ref[...], preferred_element_type=f32)
          + jnp.dot(cw_ref[...].astype(bf16), w1b_ref[...],
                    preferred_element_type=f32)
          + b1_ref[...])
    h1 = jnp.maximum(h1, 0.0)                                     # ReLU (Dropout=id)

    # Linear(256, 128) + ReLU.
    h2 = jnp.dot(h1.astype(bf16), w2_ref[...],
                 preferred_element_type=f32) + b2_ref[...]
    h2 = jnp.maximum(h2, 0.0)                                     # ReLU (Dropout=id)

    # Linear(128, 1): VPU multiply + lane reduce instead of an N=1 MXU pass.
    out_ref[...] = jnp.sum(h2 * w3_ref[...], axis=-1, keepdims=True) + b3_ref[...]


# -----------------------------------------------------------------------------
# One-time (init-time) parameter layout + dtype preparation.
# -----------------------------------------------------------------------------
def prepare_params(params):
    """Hoisted out of the per-call path: runs once at init time."""
    bf16 = jnp.bfloat16
    f32 = jnp.float32

    conv_w = np.asarray(params["conv_w"], dtype=np.float32)       # (32, C, 5, A)
    conv_b = np.asarray(params["conv_b"], dtype=np.float32)
    w1 = np.asarray(params["w1"], dtype=np.float32)               # (256, 32*T + A)
    OC, C, KH, A = conv_w.shape
    cnn_dim = w1.shape[1] - A
    T = cnn_dim // OC
    W = T + KH - 1
    CA = C * A
    H1 = w1.shape[0]

    # Per-tap block: wk[kh*CA + c*A + a, o] = conv_w[o, c, kh, a]
    wk = conv_w.transpose(2, 1, 3, 0).reshape(KH * CA, OC)

    # Block-Toeplitz conv weight: one matmul computes all T conv windows.
    # wt[(t+kh)*CA + c*A + a, t*OC + o] = conv_w[o, c, kh, a]
    wt = np.zeros((W * CA, T * OC), dtype=np.float32)
    for t in range(T):
        wt[t * CA:(t + KH) * CA, t * OC:(t + 1) * OC] = wk
    cb = np.tile(conv_b, T).reshape(1, T * OC)                    # bias per (t, o)

    # Layer-1 conv-half weight, rows in (t*OC + o) order to match the Toeplitz
    # output columns.  PyTorch Flatten of (OC, T, 1) -> w1 column index o*T + t.
    w1a = (w1[:, :cnn_dim].reshape(H1, OC, T)
           .transpose(2, 1, 0).reshape(T * OC, H1))               # [t*OC+o, d]
    w1b = w1[:, cnn_dim:].T                                       # (A, 256)

    return {
        "wt": jnp.asarray(wt, bf16),
        "cb": jnp.asarray(cb, f32),
        "w1a": jnp.asarray(w1a, bf16),
        "w1b": jnp.asarray(w1b, bf16),
        "b1": jnp.asarray(params["b1"], f32).reshape(1, -1),
        "w2": jnp.asarray(params["w2"], f32).T.astype(bf16),
        "b2": jnp.asarray(params["b2"], f32).reshape(1, -1),
        "w3": jnp.asarray(params["w3"], f32).reshape(1, -1),      # (1, 128) f32 row
        "b3": jnp.asarray(params["b3"], f32).reshape(1, 1),
    }


def _pick_batch_tile(batch):
    """>=2 grid steps when B >= 16 (dual-TC / DMA overlap); tiles are multiples
    of 16 (bf16 sublane packing), capped at 256.  Tiny batches use one full tile."""
    if batch < 16:
        return batch
    half = batch // 2
    tile = (min(256, half) // 16) * 16
    return tile if tile > 0 else 8


@jax.jit
def critic_cnn_forward(market_image, current_weights, prep):
    """market_image: (B, C, W, A) f32, current_weights: (B, A) f32."""
    B, C, W, A = market_image.shape
    KH, OC = 5, 32
    T = W - KH + 1
    CA = C * A

    # Only per-call glue: layout permute + bf16 cast fused into one XLA op, so
    # every conv window is a contiguous lane range and HBM read traffic halves.
    x2 = (market_image.transpose(0, 2, 1, 3)
          .reshape(B, W * CA).astype(jnp.bfloat16))
    cw = current_weights

    tile = _pick_batch_tile(B)
    b_pad = ((B + tile - 1) // tile) * tile
    if b_pad != B:                       # pad-and-slice instead of bt=B fallback
        x2 = jnp.pad(x2, ((0, b_pad - B), (0, 0)))
        cw = jnp.pad(cw, ((0, b_pad - B), (0, 0)))
    grid = (b_pad // tile,)

    def resident(a):                     # full-array block, constant index map
        n = a.ndim
        return pl.BlockSpec(a.shape, lambda i, _n=n: (0,) * _n)

    out = pl.pallas_call(
        critic_kernel,
        out_shape=jax.ShapeDtypeStruct((b_pad, 1), jnp.float32),
        grid=grid,
        in_specs=[
            pl.BlockSpec((tile, W * CA), lambda i: (i, 0)),    # image tile (bf16)
            pl.BlockSpec((tile, A), lambda i: (i, 0)),         # current_weights tile
            resident(prep["wt"]),
            resident(prep["cb"]),
            resident(prep["w1a"]),
            resident(prep["w1b"]),
            resident(prep["b1"]),
            resident(prep["w2"]),
            resident(prep["b2"]),
            resident(prep["w3"]),
            resident(prep["b3"]),
        ],
        out_specs=pl.BlockSpec((tile, 1), lambda i: (i, 0)),
        compiler_params=pltpu.CompilerParams(
            dimension_semantics=("parallel",)),
    )(x2, cw, prep["wt"], prep["cb"], prep["w1a"], prep["w1b"],
      prep["b1"], prep["w2"], prep["b2"], prep["w3"], prep["b3"])

    return out[:B] if b_pad != B else out


# -----------------------------------------------------------------------------
# Pure-JAX reference (mirrors the PyTorch module, eval mode, f32 weights).
# -----------------------------------------------------------------------------
def critic_cnn_reference(market_image, current_weights, params):
    conv = lax.conv_general_dilated(
        market_image, params["conv_w"], window_strides=(1, 1), padding="VALID",
        dimension_numbers=("NCHW", "OIHW", "NCHW"))               # (B, 32, T, 1)
    conv = conv + params["conv_b"].reshape(1, -1, 1, 1)
    conv = jnp.maximum(conv, 0.0)
    cnn_out = conv.reshape(conv.shape[0], -1)                     # flatten: o*T + t
    x = jnp.concatenate([cnn_out, current_weights], axis=1)
    h1 = jnp.maximum(x @ params["w1"].T + params["b1"], 0.0)
    h2 = jnp.maximum(h1 @ params["w2"].T + params["b2"], 0.0)
    return h2 @ params["w3"].T + params["b3"]


def init_params(key, n_features, n_assets, window_size):
    OC, KH = 32, 5
    T = window_size - KH + 1
    cnn_dim = OC * T
    dims = {
        "conv_w": (OC, n_features, KH, n_assets),
        "conv_b": (OC,),
        "w1": (256, cnn_dim + n_assets), "b1": (256,),
        "w2": (128, 256), "b2": (128,),
        "w3": (1, 128), "b3": (1,),
    }
    fan_in = {
        "conv_w": n_features * KH * n_assets, "conv_b": n_features * KH * n_assets,
        "w1": cnn_dim + n_assets, "b1": cnn_dim + n_assets,
        "w2": 256, "b2": 256, "w3": 128, "b3": 128,
    }
    params = {}
    for name, shape in dims.items():
        key, sub = jax.random.split(key)
        bound = 1.0 / np.sqrt(fan_in[name])
        params[name] = jax.random.uniform(sub, shape, jnp.float32, -bound, bound)
    return params


if __name__ == "__main__":
    # Small shapes consistent with the module: batch=2, n_features=4,
    # window_size=16, n_assets=8  ->  cnn_out_dim = 32 * 12 = 384.
    C, W, A = 4, 16, 8

    key = jax.random.PRNGKey(0)
    kp, kx, kw = jax.random.split(key, 3)
    params = init_params(kp, C, A, W)
    prep = prepare_params(params)          # one-time layout/bf16 preparation

    # Case 1: tiny batch (single-step grid, full-array tile).
    B = 2
    market_image = jax.random.normal(kx, (B, C, W, A), jnp.float32)
    raw_w = jax.random.uniform(kw, (B, A), jnp.float32)
    current_weights = raw_w / jnp.sum(raw_w, axis=1, keepdims=True)

    out = critic_cnn_forward(market_image, current_weights, prep)
    out = jax.block_until_ready(out)
    ref = critic_cnn_reference(market_image, current_weights, params)
    assert out.shape == (B, 1)
    # bf16 weights / matmul inputs -> looser tolerance vs the f32 reference.
    np.testing.assert_allclose(np.asarray(out), np.asarray(ref), rtol=2e-2, atol=2e-2)

    # Case 2: awkward batch (exercises the pad-and-slice multi-step grid path).
    B2 = 20
    kx2, kw2 = jax.random.split(kx)
    mi2 = jax.random.normal(kx2, (B2, C, W, A), jnp.float32)
    rw2 = jax.random.uniform(kw2, (B2, A), jnp.float32)
    cw2 = rw2 / jnp.sum(rw2, axis=1, keepdims=True)
    out2 = jax.block_until_ready(critic_cnn_forward(mi2, cw2, prep))
    ref2 = critic_cnn_reference(mi2, cw2, params)
    assert out2.shape == (B2, 1)
    np.testing.assert_allclose(np.asarray(out2), np.asarray(ref2), rtol=2e-2, atol=2e-2)

    print("KERNEL_OK")
</pallas_src>

<mosaic_0001>
module attributes {stable_mosaic.version = 11 : i64} {
  func.func @critic_kernel(%arg0: i32, %arg1: memref<2x512xbf16, #tpu.memory_space<vmem>>, %arg2: memref<2x8xf32, #tpu.memory_space<vmem>>, %arg3: memref<512x384xbf16, #tpu.memory_space<vmem>>, %arg4: memref<1x384xf32, #tpu.memory_space<vmem>>, %arg5: memref<384x256xbf16, #tpu.memory_space<vmem>>, %arg6: memref<8x256xbf16, #tpu.memory_space<vmem>>, %arg7: memref<1x256xf32, #tpu.memory_space<vmem>>, %arg8: memref<256x128xbf16, #tpu.memory_space<vmem>>, %arg9: memref<1x128xf32, #tpu.memory_space<vmem>>, %arg10: memref<1x128xf32, #tpu.memory_space<vmem>>, %arg11: memref<1x1xf32, #tpu.memory_space<vmem>>, %arg12: memref<2x1xf32, #tpu.memory_space<vmem>>) attributes {dimension_semantics = [#tpu.dimension_semantics<parallel>], iteration_bounds = array<i64: 1>, scalar_prefetch = 0 : i64, scratch_operands = 0 : i64, tpu.core_type = #tpu.core_type<tc>, window_params = [{transform_indices = @transform_0, window_bounds = array<i64: 2, 512>}, {transform_indices = @transform_1, window_bounds = array<i64: 2, 8>}, {pipeline_mode = #tpu.pipeline_mode<synchronous>, transform_indices = @transform_2, window_bounds = array<i64: 512, 384>}, {pipeline_mode = #tpu.pipeline_mode<synchronous>, transform_indices = @transform_3, window_bounds = array<i64: 1, 384>}, {pipeline_mode = #tpu.pipeline_mode<synchronous>, transform_indices = @transform_4, window_bounds = array<i64: 384, 256>}, {pipeline_mode = #tpu.pipeline_mode<synchronous>, transform_indices = @transform_5, window_bounds = array<i64: 8, 256>}, {pipeline_mode = #tpu.pipeline_mode<synchronous>, transform_indices = @transform_6, window_bounds = array<i64: 1, 256>}, {pipeline_mode = #tpu.pipeline_mode<synchronous>, transform_indices = @transform_7, window_bounds = array<i64: 256, 128>}, {pipeline_mode = #tpu.pipeline_mode<synchronous>, transform_indices = @transform_8, window_bounds = array<i64: 1, 128>}, {pipeline_mode = #tpu.pipeline_mode<synchronous>, transform_indices = @transform_9, window_bounds = array<i64: 1, 128>}, {pipeline_mode = #tpu.pipeline_mode<synchronous>, transform_indices = @transform_10, window_bounds = array<i64: 1, 1>}, {transform_indices = @transform_11, window_bounds = array<i64: 2, 1>}]} {
    %c0 = arith.constant 0 : index
    %c0_0 = arith.constant 0 : index
    %0 = vector.load %arg1[%c0, %c0_0] : memref<2x512xbf16, #tpu.memory_space<vmem>>, vector<2x512xbf16>
    %c0_1 = arith.constant 0 : index
    %c0_2 = arith.constant 0 : index
    %1 = vector.load %arg3[%c0_1, %c0_2] : memref<512x384xbf16, #tpu.memory_space<vmem>>, vector<512x384xbf16>
    %cst = arith.constant dense<0.000000e+00> : vector<2x384xf32>
    %2 = tpu.matmul %0, %1, %cst {dimension_numbers = #tpu.dot_dimension_numbers<[1], [0], [0], [1], [0, 0, 1, 1], [], []>} : vector<2x512xbf16>, vector<512x384xbf16>, vector<2x384xf32> -> vector<2x384xf32>
    %c0_3 = arith.constant 0 : index
    %c0_4 = arith.constant 0 : index
    %3 = vector.load %arg4[%c0_3, %c0_4] : memref<1x384xf32, #tpu.memory_space<vmem>>, vector<1x384xf32>
    %4 = vector.broadcast %3 : vector<1x384xf32> to vector<2x384xf32>
    %5 = arith.addf %2, %4 : vector<2x384xf32>
    %cst_5 = arith.constant 0.000000e+00 : f32
    %6 = vector.broadcast %cst_5 : f32 to vector<2x384xf32>
    %7 = arith.maximumf %5, %6 : vector<2x384xf32>
    %8 = arith.truncf %7 : vector<2x384xf32> to vector<2x384xbf16>
    %c0_6 = arith.constant 0 : index
    %c0_7 = arith.constant 0 : index
    %9 = vector.load %arg5[%c0_6, %c0_7] : memref<384x256xbf16, #tpu.memory_space<vmem>>, vector<384x256xbf16>
    %cst_8 = arith.constant dense<0.000000e+00> : vector<2x256xf32>
    %10 = tpu.matmul %8, %9, %cst_8 {dimension_numbers = #tpu.dot_dimension_numbers<[1], [0], [0], [1], [0, 0, 1, 1], [], []>} : vector<2x384xbf16>, vector<384x256xbf16>, vector<2x256xf32> -> vector<2x256xf32>
    %c0_9 = arith.constant 0 : index
    %c0_10 = arith.constant 0 : index
    %11 = vector.load %arg2[%c0_9, %c0_10] : memref<2x8xf32, #tpu.memory_space<vmem>>, vector<2x8xf32>
    %12 = arith.truncf %11 : vector<2x8xf32> to vector<2x8xbf16>
    %c0_11 = arith.constant 0 : index
    %c0_12 = arith.constant 0 : index
    %13 = vector.load %arg6[%c0_11, %c0_12] : memref<8x256xbf16, #tpu.memory_space<vmem>>, vector<8x256xbf16>
    %cst_13 = arith.constant dense<0.000000e+00> : vector<2x256xf32>
    %14 = tpu.matmul %12, %13, %cst_13 {dimension_numbers = #tpu.dot_dimension_numbers<[1], [0], [0], [1], [0, 0, 1, 1], [], []>} : vector<2x8xbf16>, vector<8x256xbf16>, vector<2x256xf32> -> vector<2x256xf32>
    %15 = arith.addf %10, %14 : vector<2x256xf32>
    %c0_14 = arith.constant 0 : index
    %c0_15 = arith.constant 0 : index
    %16 = vector.load %arg7[%c0_14, %c0_15] : memref<1x256xf32, #tpu.memory_space<vmem>>, vector<1x256xf32>
    %17 = vector.broadcast %16 : vector<1x256xf32> to vector<2x256xf32>
    %18 = arith.addf %15, %17 : vector<2x256xf32>
    %cst_16 = arith.constant 0.000000e+00 : f32
    %19 = vector.broadcast %cst_16 : f32 to vector<2x256xf32>
    %20 = arith.maximumf %18, %19 : vector<2x256xf32>
    %21 = arith.truncf %20 : vector<2x256xf32> to vector<2x256xbf16>
    %c0_17 = arith.constant 0 : index
    %c0_18 = arith.constant 0 : index
    %22 = vector.load %arg8[%c0_17, %c0_18] : memref<256x128xbf16, #tpu.memory_space<vmem>>, vector<256x128xbf16>
    %cst_19 = arith.constant dense<0.000000e+00> : vector<2x128xf32>
    %23 = tpu.matmul %21, %22, %cst_19 {dimension_numbers = #tpu.dot_dimension_numbers<[1], [0], [0], [1], [0, 0, 1, 1], [], []>} : vector<2x256xbf16>, vector<256x128xbf16>, vector<2x128xf32> -> vector<2x128xf32>
    %c0_20 = arith.constant 0 : index
    %c0_21 = arith.constant 0 : index
    %24 = vector.load %arg9[%c0_20, %c0_21] : memref<1x128xf32, #tpu.memory_space<vmem>>, vector<1x128xf32>
    %25 = vector.broadcast %24 : vector<1x128xf32> to vector<2x128xf32>
    %26 = arith.addf %23, %25 : vector<2x128xf32>
    %cst_22 = arith.constant 0.000000e+00 : f32
    %27 = vector.broadcast %cst_22 : f32 to vector<2x128xf32>
    %28 = arith.maximumf %26, %27 : vector<2x128xf32>
    %c0_23 = arith.constant 0 : index
    %c0_24 = arith.constant 0 : index
    %29 = vector.load %arg10[%c0_23, %c0_24] : memref<1x128xf32, #tpu.memory_space<vmem>>, vector<1x128xf32>
    %30 = vector.broadcast %29 : vector<1x128xf32> to vector<2x128xf32>
    %31 = arith.mulf %28, %30 : vector<2x128xf32>
    %cst_25 = arith.constant dense<0.000000e+00> : vector<2xf32>
    %32 = vector.multi_reduction <add>, %31, %cst_25 [1] : vector<2x128xf32> to vector<2xf32>
    %33 = vector.shape_cast %32 : vector<2xf32> to vector<2x1xf32>
    %c0_26 = arith.constant 0 : index
    %c0_27 = arith.constant 0 : index
    %34 = vector.load %arg11[%c0_26, %c0_27] : memref<1x1xf32, #tpu.memory_space<vmem>>, vector<1x1xf32>
    %35 = vector.broadcast %34 : vector<1x1xf32> to vector<2x1xf32>
    %36 = arith.addf %33, %35 : vector<2x1xf32>
    %c0_28 = arith.constant 0 : index
    %c0_29 = arith.constant 0 : index
    %37 = vector.load %arg12[%c0_28, %c0_29] : memref<2x1xf32, #tpu.memory_space<vmem>>, vector<2x1xf32>
    tpu.vector_store %arg12[%c0_28, %c0_29], %36 {strides = array<i32>} : memref<2x1xf32, #tpu.memory_space<vmem>>, vector<2x1xf32>,
    return
  }
  func.func @transform_0(%arg0: i32) -> (i32, i32) {
    %c0_i32 = arith.constant 0 : i32
    %c0_i32_0 = arith.constant 0 : i32
    return %arg0, %c0_i32 : i32, i32
  }
  func.func @transform_1(%arg0: i32) -> (i32, i32) {
    %c0_i32 = arith.constant 0 : i32
    %c0_i32_0 = arith.constant 0 : i32
    return %arg0, %c0_i32 : i32, i32
  }
  func.func @transform_2(%arg0: i32) -> (i32, i32) {
    %c0_i32 = arith.constant 0 : i32
    %c0_i32_0 = arith.constant 0 : i32
    %c0_i32_1 = arith.constant 0 : i32
    return %c0_i32, %c0_i32_0 : i32, i32
  }
  func.func @transform_3(%arg0: i32) -> (i32, i32) {
    %c0_i32 = arith.constant 0 : i32
    %c0_i32_0 = arith.constant 0 : i32
    %c0_i32_1 = arith.constant 0 : i32
    return %c0_i32, %c0_i32_0 : i32, i32
  }
  func.func @transform_4(%arg0: i32) -> (i32, i32) {
    %c0_i32 = arith.constant 0 : i32
    %c0_i32_0 = arith.constant 0 : i32
    %c0_i32_1 = arith.constant 0 : i32
    return %c0_i32, %c0_i32_0 : i32, i32
  }
  func.func @transform_5(%arg0: i32) -> (i32, i32) {
    %c0_i32 = arith.constant 0 : i32
    %c0_i32_0 = arith.constant 0 : i32
    %c0_i32_1 = arith.constant 0 : i32
    return %c0_i32, %c0_i32_0 : i32, i32
  }
  func.func @transform_6(%arg0: i32) -> (i32, i32) {
    %c0_i32 = arith.constant 0 : i32
    %c0_i32_0 = arith.constant 0 : i32
    %c0_i32_1 = arith.constant 0 : i32
    return %c0_i32, %c0_i32_0 : i32, i32
  }
  func.func @transform_7(%arg0: i32) -> (i32, i32) {
    %c0_i32 = arith.constant 0 : i32
    %c0_i32_0 = arith.constant 0 : i32
    %c0_i32_1 = arith.constant 0 : i32
    return %c0_i32, %c0_i32_0 : i32, i32
  }
  func.func @transform_8(%arg0: i32) -> (i32, i32) {
    %c0_i32 = arith.constant 0 : i32
    %c0_i32_0 = arith.constant 0 : i32
    %c0_i32_1 = arith.constant 0 : i32
    return %c0_i32, %c0_i32_0 : i32, i32
  }
  func.func @transform_9(%arg0: i32) -> (i32, i32) {
    %c0_i32 = arith.constant 0 : i32
    %c0_i32_0 = arith.constant 0 : i32
    %c0_i32_1 = arith.constant 0 : i32
    return %c0_i32, %c0_i32_0 : i32, i32
  }
  func.func @transform_10(%arg0: i32) -> (i32, i32) {
    %c0_i32 = arith.constant 0 : i32
    %c0_i32_0 = arith.constant 0 : i32
    %c0_i32_1 = arith.constant 0 : i32
    return %c0_i32, %c0_i32_0 : i32, i32
  }
  func.func @transform_11(%arg0: i32) -> (i32, i32) {
    %c0_i32 = arith.constant 0 : i32
    %c0_i32_0 = arith.constant 0 : i32
    return %arg0, %c0_i32 : i32, i32
  }
}

</mosaic_0001>

<bundles_post_ra>
// kernel: critic_cnn_forward.1
= control target key start
LH: loop header
LB: loop body
LE: loop exit
PB: predicated region body
PF: predicated region fallthrough
CT: control target
= control target key end

     0   :  { %s2275_s0 = inlined_call_operand.vmem [shape: bf16[2,512], index: 0, kind: input, shape index: {}]   ;;  %s2276_s1 = inlined_call_operand.vmem [shape: f32[2,8], index: 1, kind: input, shape index: {}]   ;;  %s2277_s2 = inlined_call_operand.hbm [shape: bf16[512,384], index: 2, kind: input, shape index: {}]   ;;  %s2278_s3 = inlined_call_operand.vmem [shape: f32[1,384], index: 3, kind: input, shape index: {}]   ;;  %s2279_s4 = inlined_call_operand.hbm [shape: bf16[384,256], index: 4, kind: input, shape index: {}]   ;;  %s2280_s5 = inlined_call_operand.vmem [shape: bf16[8,256], index: 5, kind: input, shape index: {}]   ;;  %s2281_s6 = inlined_call_operand.vmem [shape: f32[1,256], index: 6, kind: input, shape index: {}]   ;;  %s2282_s7 = inlined_call_operand.vmem [shape: bf16[256,128], index: 7, kind: input, shape index: {}]   ;;  %s2283_s8 = inlined_call_operand.vmem [shape: f32[1,128], index: 8, kind: input, shape index: {}]   ;;  %s2284_s9 = inlined_call_operand.vmem [shape: f32[1,128], index: 9, kind: input, shape index: {}]   ;;  %s2285_s10 = inlined_call_operand.<no memory space> [shape: f32[1,1], index: 10, kind: input, shape index: {}]   ;;  %s2286_s11 = inlined_call_operand.vmem [shape: f32[2,1], index: 11, kind: output, shape index: {}]  }
   0x1   :  { %v16_v0 = vstv %s2285_s10 }
   0x2   :  { %17 = vst [vmem:[#allocation2] sm:$0x1] %v16_v0 }
   0x3   :  { %18 = vsyncpa [#allocation4], 0 }
   0x4   :  { %19 = vsyncpa [#allocation6], 0  ;;  %s2090_s19 = smov [#allocation3]   ;;  %s2042_s23 = scalar_lea.hbm %s2277_s2, 12288 }
   0x5   :  { %s29_s20 = sshll.u32 %s2090_s19, 4  ;;  %p2043_p0 = scmp.ne.s32.totalorder %s2277_s2, %s2042_s23  ;;  %s30_s20 = int_to_ptr.vmem [resolvable:$true] %s29_s20 }
   0x6   :  { %p2046_p1 = scmp.lt.u32.totalorder %s2042_s23, %s2277_s2 }
   0x8   :  { %p2048_p2 = pnand %p2046_p1, %p2043_p0 }
   0xa   :  { %2051 = shalt.err (!%p2048_p2)
}
   0xb   :  { %s2052_s10 = scalar_lea.vmem %s30_s20, 12288  ;;  %p2057_p4 = scmp.lt.s32.totalorder %s30_s20, %s30_s20 }
   0xc   :  { %p2053_p3 = scmp.ne.s32.totalorder %s30_s20, %s2052_s10  ;;  %p2058_p5 = scmp.lt.s32.totalorder %s2052_s10, %s2052_s10 }
   0xe   :  { %p2059_p6 = por %p2058_p5, %p2057_p4 }
  0x10   :  { %p2060_p7 = pnand %p2059_p6, %p2053_p3 }
  0x12   :  { %2063 = shalt.err (!%p2060_p7)
}
  0x13   :  { %s2091_s28 = smov 192   ;;  %s2092_s29 = smov 12  }
  0x14   :  { %35 = dma.hbm_to_vmem [thread:$0]  %s2277_s2, 12288, %s30_s20, [#allocation4], %s2091_s28, %s2091_s28, %s2092_s29  }
  0x15   :  { %s2093_s13 = smov [#allocation5]   ;;  %s2064_s17 = scalar_lea.hbm %s2279_s4, 6144 }
  0x16   :  { %s43_s14 = sshll.u32 %s2093_s13, 4  ;;  %p2065_p8 = scmp.ne.s32.totalorder %s2279_s4, %s2064_s17  ;;  %s44_s14 = int_to_ptr.vmem [resolvable:$true] %s43_s14 }
  0x17   :  { %p2068_p9 = scmp.lt.u32.totalorder %s2064_s17, %s2279_s4 }
  0x19   :  { %p2070_p10 = pnand %p2068_p9, %p2065_p8 }
  0x1b   :  { %2073 = shalt.err (!%p2070_p10)
}
  0x1c   :  { %s2074_s23 = scalar_lea.vmem %s44_s14, 6144  ;;  %p2079_p12 = scmp.lt.s32.totalorder %s44_s14, %s44_s14 }
  0x1d   :  { %p2075_p11 = scmp.ne.s32.totalorder %s44_s14, %s2074_s23  ;;  %p2080_p13 = scmp.lt.s32.totalorder %s2074_s23, %s2074_s23 }
  0x1f   :  { %p2081_p0 = por %p2080_p13, %p2079_p12 }
  0x21   :  { %p2082_p1 = pnand %p2081_p0, %p2075_p11 }
  0x23   :  { %2085 = shalt.err (!%p2082_p1)
}
  0x24   :  { %s2094_s2 = smov 128   ;;  %s2095_s20 = smov 8  }
  0x25   :  { %49 = dma.hbm_to_vmem [thread:$0]  %s2279_s4, 6144, %s44_s14, [#allocation6], %s2094_s2, %s2094_s2, %s2095_s20  }
  0x26   :  { %2086 = dma.done.wait [#allocation4], 12288  }
  0x27   :  { %2087 = vsyncadd [#allocation4], 4294955008 }
  0x28   :  { %2088 = dma.done.wait [#allocation6], 6144  }
  0x29   :  { %2089 = vsyncadd [#allocation6], 4294961152  ;;  %v1824_v1 = vld [vmem:[#allocation3 + $0x4] ss:$12 sps:$4 sm:$0xff]   ;;  %v1826_v2 = vld [vmem:[#allocation3] ss:$12 sps:$4 sm:$0xff]   ;;  %v200_v27 = vlaneseq }
  0x2a   :  { %756 = vmatprep.subr.bf16.mxu0 %v1824_v1  ;;  %v1827_v3 = vld [vmem:[#allocation3 + $0x1c] ss:$12 sps:$4 sm:$0xff]   ;;  %v1829_v4 = vld [vmem:[#allocation3 + $0x18] ss:$12 sps:$4 sm:$0xff]   ;;  %v1830_v5 = vld [vmem:[#allocation3 + $0x34] ss:$12 sps:$4 sm:$0xff]  }
  0x2b   :  { %757 = vmatpush1.bf16.msra.mxu0 %v1826_v2  ;;  %v1832_v6 = vld [vmem:[#allocation3 + $0x30] ss:$12 sps:$4 sm:$0xff]   ;;  %v1833_v7 = vld [vmem:[#allocation3 + $0x4c] ss:$12 sps:$4 sm:$0xff]   ;;  %v1835_v8 = vld [vmem:[#allocation3 + $0x48] ss:$12 sps:$4 sm:$0xff]  }
  0x2c   :  { %758 = vmatprep.subr.bf16.mxu0 %v1827_v3  ;;  %v1836_v9 = vld [vmem:[#allocation3 + $0x64] ss:$12 sps:$4 sm:$0xff]   ;;  %v1850_v10 = vld [vmem:[#allocation3 + $0xc8] ss:$12 sps:$4 sm:$0xff]   ;;  %v1838_v12 = vld [vmem:[#allocation3 + $0x60] ss:$12 sps:$4 sm:$0xff]  }
  0x2d   :  { %v1852_v11 = vld [vmem:[#allocation3 + $0x8] ss:$12 sps:$4 sm:$0xff]   ;;  %1744 = vmatprep.subr.bf16.mxu1 %v1850_v10  ;;  %v1855_v13 = vld [vmem:[#allocation3 + $0xe0] ss:$12 sps:$4 sm:$0xff]   ;;  %v1841_v16 = vld [vmem:[#allocation3 + $0x78] ss:$12 sps:$4 sm:$0xff]  }
  0x2e   :  { %1745 = vmatpush3.bf16.msra.mxu1 %v1852_v11  ;;  %v1839_v14 = vld [vmem:[#allocation3 + $0x7c] ss:$12 sps:$4 sm:$0xff]   ;;  %v1857_v15 = vld [vmem:[#allocation3 + $0x20] ss:$12 sps:$4 sm:$0xff]   ;;  %v1860_v18 = vld [vmem:[#allocation3 + $0xf8] ss:$12 sps:$4 sm:$0xff]  }
  0x2f   :  { %759 = vmatpush1.bf16.msra.mxu0 %v1829_v4  ;;  %1746 = vmatprep.subr.bf16.mxu1 %v1855_v13  ;;  %v1842_v17 = vld [vmem:[#allocation3 + $0x94] ss:$12 sps:$4 sm:$0xff]   ;;  %v1862_v19 = vld [vmem:[#allocation3 + $0x38] ss:$12 sps:$4 sm:$0xff]   ;;  %v1844_v20 = vld [vmem:[#allocation3 + $0x90] ss:$12 sps:$4 sm:$0xff]  }
  0x30   :  { %760 = vmatprep.subr.bf16.mxu0 %v1830_v5  ;;  %v1865_v21 = vld [vmem:[#allocation3 + $0x110] ss:$12 sps:$4 sm:$0xff]   ;;  %v1845_v23 = vld [vmem:[#allocation3 + $0xac] ss:$12 sps:$4 sm:$0xff]   ;;  %v1870_v24 = vld [vmem:[#allocation3 + $0x128] ss:$12 sps:$4 sm:$0xff]  }
  0x31   :  { %v1867_v22 = vld [vmem:[#allocation3 + $0x50] ss:$12 sps:$4 sm:$0xff]   ;;  %v1847_v25 = vld [vmem:[#allocation3 + $0xa8] ss:$12 sps:$4 sm:$0xff]   ;;  %v2096_v29 = vmov 1966171168  }
  0x32   :  { %1747 = vmatpush3.bf16.msra.mxu1 %v1857_v15  ;;  %v1872_v26 = vld [vmem:[#allocation3 + $0x68] ss:$12 sps:$4 sm:$0xff]   ;;  %v1848_v28 = vld [vmem:[#allocation3 + $0xc4] ss:$12 sps:$4 sm:$0xff]   ;;  %v225_v30 = vunpack.c.l.s4 %v2096_v29  ;;  %v1875_v31 = vld [vmem:[#allocation3 + $0x140] ss:$12 sps:$4 sm:$0xff]  }
  0x33   :  { %761 = vmatpush1.bf16.msra.mxu0 %v1832_v6  ;;  %1748 = vmatprep.subr.bf16.mxu1 %v1860_v18  ;;  %v1851_v32 = vld [vmem:[#allocation3 + $0xc0] ss:$12 sps:$4 sm:$0xff]   ;;  %v2185_v34 = vshrl.u32 %v200_v27, 7  ;;  %v1853_v35 = vld [vmem:[#allocation3 + $0xdc] ss:$12 sps:$4 sm:$0xff]   ;;  %vm984_vm0 = vcmask 1043456  }
  0x34   :  { %762 = vmatprep.subr.bf16.mxu0 %v1833_v7  ;;  %v1877_v33 = vld [vmem:[#allocation3 + $0x80] ss:$12 sps:$4 sm:$0xff]   ;;  %v1880_v36 = vld [vmem:[#allocation3 + $0x158] ss:$12 sps:$4 sm:$0xff]   ;;  %v226_v37 = vunpack.c.0.s8 %v225_v30  ;;  %v1885_v41 = vld [vmem:[#allocation3 + $0x170] ss:$12 sps:$4 sm:$0xff]  }
  0x35   :  { %v1856_v38 = vld [vmem:[#allocation3 + $0xd8] ss:$12 sps:$4 sm:$0xff]   ;;  %v1858_v39 = vld [vmem:[#allocation3 + $0xf4] ss:$12 sps:$4 sm:$0xff]   ;;  %v1861_v43 = vld [vmem:[#allocation3 + $0xf0] ss:$12 sps:$4 sm:$0xff]  }
  0x36   :  { %1749 = vmatpush3.bf16.msra.mxu1 %v1862_v19  ;;  %v1882_v40 = vld [vmem:[#allocation3 + $0x98] ss:$12 sps:$4 sm:$0xff]   ;;  %v229_v42 = vsub.s32 %v226_v37, %v2185_v34  ;;  %v1576_v44 = vld.sshfl [vmem:[%s2275_s0] sm:$0x33 pattern:$0x75316420] }
  0x37   :  { %763 = vmatpush1.bf16.msra.mxu0 %v1835_v8  ;;  %1750 = vmatprep.subr.bf16.mxu1 %v1865_v21  ;;  %v1863_v45 = vld [vmem:[#allocation3 + $0x10c] ss:$12 sps:$4 sm:$0xff]   ;;  %v223_v46 = vcombine.high %v1576_v44, %v1576_v44  ;;  %v1887_v47 = vld [vmem:[#allocation3 + $0xb0] ss:$12 sps:$4 sm:$0xff]   ;;  %v1891_v49 = vld [vmem:[#allocation3 + $0x248] ss:$12 sps:$4 sm:$0xff]  }
  0x38   :  { %764 = vmatprep.subr.bf16.mxu0 %v1836_v9  ;;  %v1866_v50 = vld [vmem:[#allocation3 + $0x108] ss:$12 sps:$4 sm:$0xff]   ;;  %v1868_v51 = vld [vmem:[#allocation3 + $0x124] ss:$12 sps:$4 sm:$0xff]   ;;  %v2191_v52 = vrot.slane %v1576_v44, %v229_v42  ;;  %v1896_v54 = vld [vmem:[#allocation3 + $0x260] ss:$12 sps:$4 sm:$0xff]  }
  0x39   :  { %v237_v48 = vrot.slane %v223_v46, %v229_v42  ;;  %v1892_v53 = vld [vmem:[#allocation3 + $0x188] ss:$12 sps:$4 sm:$0xff]   ;;  %v1871_v55 = vld [vmem:[#allocation3 + $0x120] ss:$12 sps:$4 sm:$0xff]   ;;  %v1901_v59 = vld [vmem:[#allocation3 + $0x278] ss:$12 sps:$4 sm:$0xff]  }
  0x3a   :  { %1751 = vmatpush3.bf16.msra.mxu1 %v1867_v22  ;;  %v1873_v57 = vld [vmem:[#allocation3 + $0x13c] ss:$12 sps:$4 sm:$0xff]   ;;  %v1897_v58 = vld [vmem:[#allocation3 + $0x1a0] ss:$12 sps:$4 sm:$0xff]   ;;  %v1876_v60 = vld [vmem:[#allocation3 + $0x138] ss:$12 sps:$4 sm:$0xff]   ;;  %v2197_v19 = vcombine.high %v2191_v52, %v2191_v52 }
  0x3b   :  { %765 = vmatpush1.bf16.msra.mxu0 %v1838_v12  ;;  %1752 = vmatprep.subr.bf16.mxu1 %v1870_v24  ;;  %v239_v56 = vcombine.high %v237_v48, %v237_v48  ;;  %v1902_v61 = vld [vmem:[#allocation3 + $0x1b8] ss:$12 sps:$4 sm:$0xff]   ;;  %v1878_v62 = vld [vmem:[#allocation3 + $0x154] ss:$12 sps:$4 sm:$0xff]   ;;  %v1906_v63 = vld [vmem:[#allocation3 + $0x290] ss:$12 sps:$4 sm:$0xff]  }
  0x3c   :  { %766 = vmatprep.subr.bf16.mxu0 %v1839_v14  ;;  %788 = vmatprep.mubr.bf16.mxu0 %v237_v48  ;;  %v1881_v0 = vld [vmem:[#allocation3 + $0x150] ss:$12 sps:$4 sm:$0xff]   ;;  %v1883_v1 = vld [vmem:[#allocation3 + $0x16c] ss:$12 sps:$4 sm:$0xff]   ;;  %v1911_v3 = vld [vmem:[#allocation3 + $0x2a8] ss:$12 sps:$4 sm:$0xff]  }
  0x3d   :  { %870 = vmatprep.mubr.bf16.mxu1 %v237_v48  ;;  %v1907_v2 = vld [vmem:[#allocation3 + $0x1d0] ss:$12 sps:$4 sm:$0xff]   ;;  %v1886_v4 = vld [vmem:[#allocation3 + $0x168] ss:$12 sps:$4 sm:$0xff]   ;;  %v1916_v7 = vld [vmem:[#allocation3 + $0x2c0] ss:$12 sps:$4 sm:$0xff]  }
  0x3e   :  { %1753 = vmatpush3.bf16.msra.mxu1 %v1872_v26  ;;  %v1890_v5 = vld [vmem:[#allocation3 + $0x184] ss:$12 sps:$4 sm:$0xff]   ;;  %v1912_v6 = vld [vmem:[#allocation3 + $0x1e8] ss:$12 sps:$4 sm:$0xff]   ;;  %v1888_v8 = vld [vmem:[#allocation3 + $0x180] ss:$12 sps:$4 sm:$0xff]  }
  0x3f   :  { %767 = vmatpush1.bf16.msra.mxu0 %v1841_v16  ;;  %1754 = vmatprep.subr.bf16.mxu1 %v1875_v31  ;;  %v1895_v9 = vld [vmem:[#allocation3 + $0x19c] ss:$12 sps:$4 sm:$0xff]   ;;  %v1917_v10 = vld [vmem:[#allocation3 + $0x200] ss:$12 sps:$4 sm:$0xff]   ;;  %v1921_v11 = vld [vmem:[#allocation3 + $0x2d8] ss:$12 sps:$4 sm:$0xff]  }
  0x40   :  { %768 = vmatprep.subr.bf16.mxu0 %v1842_v17  ;;  %v1893_v12 = vld [vmem:[#allocation3 + $0x198] ss:$12 sps:$4 sm:$0xff]   ;;  %v1900_v14 = vld [vmem:[#allocation3 + $0x1b4] ss:$12 sps:$4 sm:$0xff]   ;;  %v1926_v15 = vld [vmem:[#allocation3 + $0x2f0] ss:$12 sps:$4 sm:$0xff]  }
  0x41   :  { %v1922_v13 = vld [vmem:[#allocation3 + $0x218] ss:$12 sps:$4 sm:$0xff]   ;;  %v1898_v16 = vld [vmem:[#allocation3 + $0x1b0] ss:$12 sps:$4 sm:$0xff]   ;;  %v1908_v27 = vld [vmem:[#allocation3 + $0x1e0] ss:$12 sps:$4 sm:$0xff]  }
  0x42   :  { %1755 = vmatpush3.bf16.msra.mxu1 %v1877_v33  ;;  %v1927_v17 = vld [vmem:[#allocation3 + $0x230] ss:$12 sps:$4 sm:$0xff]   ;;  %v1905_v18 = vld [vmem:[#allocation3 + $0x1cc] ss:$12 sps:$4 sm:$0xff]   ;;  %v2097_v30 = vmov 0   ;;  %vm980_vm1 = vcmask 64512  }
  0x43   :  { %769 = vmatpush1.bf16.msra.mxu0 %v1844_v20  ;;  %1756 = vmatprep.subr.bf16.mxu1 %v1880_v36  ;;  %v1903_v20 = vld [vmem:[#allocation3 + $0x1c8] ss:$12 sps:$4 sm:$0xff]   ;;  %v974_v21 = vld [vmem:[%s2280_s5] sm:$0xff]  ;;  %v1972_v46 = vld [vmem:[#allocation5 + $0x30] ss:$8 sps:$4 sm:$0xff]   ;;  %vm1556_vm2 = vcmask 1041408  }
  0x44   :  { %770 = vmatprep.subr.bf16.mxu0 %v1845_v23  ;;  %v1910_v22 = vld [vmem:[#allocation3 + $0x1e4] ss:$12 sps:$4 sm:$0xff]   ;;  %v1674_v23 = vcombine.high %v974_v21, %v974_v21  ;;  %v1673_v24 = vcombine.low %v974_v21, %v974_v21  ;;  %v1915_v29 = vld [vmem:[#allocation3 + $0x1fc] ss:$12 sps:$4 sm:$0xff]   ;;  %v1920_v33 = vld [vmem:[#allocation3 + $0x214] ss:$12 sps:$4 sm:$0xff]  }
  0x45   :  { %v1913_v31 = vld [vmem:[#allocation3 + $0x1f8] ss:$12 sps:$4 sm:$0xff]   ;;  %v1962_v36 = vld [vmem:[#allocation5 + $0x14] ss:$8 sps:$4 sm:$0xff]   ;;  %v1966_v42 = vld [vmem:[#allocation5 + $0x20] ss:$8 sps:$4 sm:$0xff]  }
  0x46   :  { %1757 = vmatpush3.bf16.msra.mxu1 %v1882_v40  ;;  %v986_v26 = vsel %vm984_vm0, %v1673_v24, 0  ;;  %v1918_v37 = vld [vmem:[#allocation3 + $0x210] ss:$12 sps:$4 sm:$0xff]   ;;  %v1968_v40 = vld [vmem:[#allocation5 + $0x24] ss:$8 sps:$4 sm:$0xff]   ;;  %vm1568_vm3 = vcmask 1024  }
  0x47   :  { %771 = vmatpush1.bf16.msra.mxu0 %v1847_v25  ;;  %1758 = vmatprep.subr.bf16.mxu1 %v1885_v41  ;;  %v1956_v25 = vld [vmem:[#allocation5 + $0x4] ss:$8 sps:$4 sm:$0xff]   ;;  %v1923_v41 = vld [vmem:[#allocation3 + $0x228] ss:$12 sps:$4 sm:$0xff]   ;;  %v2005_v24 = vld [vmem:[#allocation5 + $0x90] ss:$8 sps:$4 sm:$0xff]  }
  0x48   :  { %772 = vmatprep.subr.bf16.mxu0 %v1848_v28  ;;  %v972_v28 = vld [vmem:[%s2276_s1] sm:$0x3]  ;;  %v1980_v48 = vld [vmem:[#allocation5 + $0x44] ss:$8 sps:$4 sm:$0xff]  }
  0x49   :  { %v1974_v44 = vld [vmem:[#allocation5 + $0x34] ss:$8 sps:$4 sm:$0xff]   ;;  %v2004_v21 = vld [vmem:[#allocation5 + $0x84] ss:$8 sps:$4 sm:$0xff]  }
  0x4a   :  { %1759 = vmatpush3.bf16.msra.mxu1 %v1887_v47  ;;  %v1933_v47 = vld [vmem:[#allocation3 + $0x25c] ss:$12 sps:$4 sm:$0xff]  }
  0x4b   :  { %773 = vmatpush1.bf16.msra.mxu0 %v1851_v32  ;;  %1766 = vmatprep.subr.bf16.mxu1 %v1891_v49  ;;  %v973_v32 = vpack.c.bf16 %v972_v28, %v972_v28  ;;  %v1931_v49 = vld [vmem:[#allocation3 + $0x258] ss:$12 sps:$4 sm:$0xff]  }
  0x4c   :  { %774 = vmatprep.subr.bf16.mxu0 %v1853_v35  ;;  %v1954_v35 = vld [vmem:[#allocation5] ss:$8 sps:$4 sm:$0xff]   ;;  %v2011_v28 = vld [vmem:[#allocation5 + $0xb0] ss:$8 sps:$4 sm:$0xff]  }
  0x4d   :  { %871 = vmatmul.mubr.bf16.vlgmr.msra.gmra.mrb[0].mxu1 %v2191_v52 }
  0x4e   :  { %1767 = vmatpush3.bf16.msra.mxu1 %v1892_v53  ;;  %910 = vmatprep.mubr.bf16.mxu1 %v239_v56  ;;  %v1939_v53 = vld [vmem:[#allocation3 + $0x28c] ss:$12 sps:$4 sm:$0xff]  }
  0x4f   :  { %775 = vmatpush1.bf16.msra.mxu0 %v1856_v38  ;;  %1768 = vmatprep.subr.bf16.mxu1 %v1896_v54  ;;  %v1925_v38 = vld [vmem:[#allocation3 + $0x22c] ss:$12 sps:$4 sm:$0xff]   ;;  %v1937_v54 = vld [vmem:[#allocation3 + $0x288] ss:$12 sps:$4 sm:$0xff]  }
  0x50   :  { %776 = vmatprep.subr.bf16.mxu0 %v1858_v39  ;;  %v1960_v39 = vld [vmem:[#allocation5 + $0x10] ss:$8 sps:$4 sm:$0xff]  }
  0x52   :  { %1769 = vmatpush3.bf16.msra.mxu1 %v1897_v58  ;;  %v1943_v58 = vld [vmem:[#allocation3 + $0x2b8] ss:$12 sps:$4 sm:$0xff]  }
  0x53   :  { %777 = vmatpush1.bf16.msra.mxu0 %v1861_v43  ;;  %1770 = vmatprep.subr.bf16.mxu1 %v1901_v59  ;;  %v1930_v43 = vld [vmem:[#allocation3 + $0x244] ss:$12 sps:$4 sm:$0xff]   ;;  %v1948_v59 = vld [vmem:[#allocation3 + $0x2d4] ss:$12 sps:$4 sm:$0xff]  }
  0x54   :  { %778 = vmatprep.subr.bf16.mxu0 %v1863_v45  ;;  %v1928_v45 = vld [vmem:[#allocation3 + $0x240] ss:$12 sps:$4 sm:$0xff]  }
  0x56   :  { %1771 = vmatpush3.bf16.msra.mxu1 %v1902_v61  ;;  %v1951_v61 = vld [vmem:[#allocation3 + $0x2ec] ss:$12 sps:$4 sm:$0xff]  }
  0x57   :  { %779 = vmatpush1.bf16.msra.mxu0 %v1866_v50  ;;  %1772 = vmatprep.subr.bf16.mxu1 %v1906_v63  ;;  %v1978_v50 = vld [vmem:[#allocation5 + $0x40] ss:$8 sps:$4 sm:$0xff]   ;;  %v1959_v63 = vld [vmem:[#allocation5 + $0x104] ss:$8 sps:$4 sm:$0xff]  }
  0x58   :  { %780 = vmatprep.subr.bf16.mxu0 %v1868_v51  ;;  %v1936_v51 = vld [vmem:[#allocation3 + $0x274] ss:$12 sps:$4 sm:$0xff]  }
  0x5a   :  { %1773 = vmatpush3.bf16.msra.mxu1 %v1907_v2  ;;  %v1963_v2 = vld [vmem:[#allocation5 + $0x110] ss:$8 sps:$4 sm:$0xff]  }
  0x5b   :  { %781 = vmatpush1.bf16.msra.mxu0 %v1871_v55  ;;  %1774 = vmatprep.subr.bf16.mxu1 %v1911_v3  ;;  %v1942_v55 = vld [vmem:[#allocation3 + $0x2a4] ss:$12 sps:$4 sm:$0xff]  }
  0x5c   :  { %782 = vmatprep.subr.bf16.mxu0 %v1873_v57  ;;  %v1945_v57 = vld [vmem:[#allocation3 + $0x2bc] ss:$12 sps:$4 sm:$0xff]   ;;  %v1971_v3 = vld [vmem:[#allocation5 + $0x124] ss:$8 sps:$4 sm:$0xff]  }
  0x5e   :  { %1775 = vmatpush3.bf16.msra.mxu1 %v1912_v6  ;;  %v1969_v6 = vld [vmem:[#allocation5 + $0x120] ss:$8 sps:$4 sm:$0xff]  }
  0x5f   :  { %783 = vmatpush1.bf16.msra.mxu0 %v1876_v60  ;;  %1776 = vmatprep.subr.bf16.mxu1 %v1916_v7  ;;  %v1946_v60 = vld [vmem:[#allocation3 + $0x2d0] ss:$12 sps:$4 sm:$0xff]  }
  0x60   :  { %784 = vmatprep.subr.bf16.mxu0 %v1878_v62  ;;  %v1949_v62 = vld [vmem:[#allocation3 + $0x2e8] ss:$12 sps:$4 sm:$0xff]  }
  0x61   :  { %v1977_v7 = vld [vmem:[#allocation5 + $0x134] ss:$8 sps:$4 sm:$0xff]  }
  0x62   :  { %1777 = vmatpush3.bf16.msra.mxu1 %v1917_v10  ;;  %v1981_v10 = vld [vmem:[#allocation5 + $0x140] ss:$8 sps:$4 sm:$0xff]  }
  0x63   :  { %785 = vmatpush1.bf16.msra.mxu0 %v1881_v0  ;;  %1778 = vmatprep.subr.bf16.mxu1 %v1921_v11  ;;  %v1957_v0 = vld [vmem:[#allocation5 + $0x100] ss:$8 sps:$4 sm:$0xff]   ;;  %v1989_v11 = vld [vmem:[#allocation5 + $0x154] ss:$8 sps:$4 sm:$0xff]  }
  0x64   :  { %786 = vmatprep.subr.bf16.mxu0 %v1883_v1  ;;  %v1965_v1 = vld [vmem:[#allocation5 + $0x114] ss:$8 sps:$4 sm:$0xff]  }
  0x66   :  { %1779 = vmatpush3.bf16.msra.mxu1 %v1922_v13  ;;  %v1990_v13 = vld [vmem:[#allocation5 + $0x60] ss:$8 sps:$4 sm:$0xff]  }
  0x67   :  { %787 = vmatpush1.bf16.msra.mxu0 %v1886_v4  ;;  %1780 = vmatprep.subr.bf16.mxu1 %v1926_v15  ;;  %v1984_v4 = vld [vmem:[#allocation5 + $0x50] ss:$8 sps:$4 sm:$0xff]   ;;  %v1993_v15 = vld [vmem:[#allocation5 + $0x160] ss:$8 sps:$4 sm:$0xff]  }
  0x68   :  { %797 = vmatprep.subr.bf16.mxu0 %v1890_v5  ;;  %v1986_v5 = vld [vmem:[#allocation5 + $0x54] ss:$8 sps:$4 sm:$0xff]  }
  0x6a   :  { %789 = vmatmul.mubr.bf16.vlgmr.msra.gmra.mrb[0].mxu0 %v2191_v52  ;;  %1781 = vmatpush3.bf16.msra.mxu1 %v1927_v17  ;;  %v1934_v52 = vld [vmem:[#allocation3 + $0x270] ss:$12 sps:$4 sm:$0xff]  }
  0x6b   :  { %798 = vmatpush1.bf16.msra.mxu0 %v1888_v8  ;;  %829 = vmatprep.mubr.bf16.mxu0 %v239_v56  ;;  %v1940_v56 = vld [vmem:[#allocation3 + $0x2a0] ss:$12 sps:$4 sm:$0xff]   ;;  %v1975_v8 = vld [vmem:[#allocation5 + $0x130] ss:$8 sps:$4 sm:$0xff]   ;;  %v1998_v17 = vld [vmem:[#allocation5 + $0x74] ss:$8 sps:$4 sm:$0xff]  }
  0x6c   :  { %799 = vmatprep.subr.bf16.mxu0 %v1895_v9  ;;  %1675 = vmatprep.subr.msk.bf16.mxu1 %vm984_vm0, %v1674_v23  ;;  %v1983_v9 = vld [vmem:[#allocation5 + $0x144] ss:$8 sps:$4 sm:$0xff]   ;;  %v2007_v23 = vld [vmem:[#allocation5 + $0x94] ss:$8 sps:$4 sm:$0xff]  }
  0x6d   :  { %911 = vmatmul.mubr.bf16.vlgmr.msra.gmra.mrb[4].mxu1 %v2197_v19 }
  0x6e   :  { %992 = vmatpush1.bf16.msra.mxu1 %v986_v26  ;;  %1023 = vmatprep.mubr.bf16.mxu1 %v2097_v30  ;;  %v2008_v26 = vld [vmem:[#allocation5 + $0xa0] ss:$8 sps:$4 sm:$0xff]  }
  0x6f   :  { %800 = vmatpush1.bf16.msra.mxu0 %v1893_v12  ;;  %1272 = vmatprep.subr.bf16.mxu1 %v1956_v25  ;;  %v1987_v12 = vld [vmem:[#allocation5 + $0x150] ss:$8 sps:$4 sm:$0xff]   ;;  %v2010_v25 = vld [vmem:[#allocation5 + $0xa4] ss:$8 sps:$4 sm:$0xff]  }
  0x70   :  { %801 = vmatprep.subr.bf16.mxu0 %v1900_v14  ;;  %v1992_v14 = vld [vmem:[#allocation5 + $0x64] ss:$8 sps:$4 sm:$0xff]  }
  0x73   :  { %802 = vmatpush1.bf16.msra.mxu0 %v1898_v16  ;;  %v1995_v16 = vld [vmem:[#allocation5 + $0x164] ss:$8 sps:$4 sm:$0xff]  }
  0x74   :  { %803 = vmatprep.subr.bf16.mxu0 %v1905_v18  ;;  %v2001_v18 = vld [vmem:[#allocation5 + $0x174] ss:$8 sps:$4 sm:$0xff]  }
  0x75   :  { %1676 = vmatmul.mubr.msk.bf16.vlgmr.msra.gmra.mrb[8].mxu1 %vm980_vm1, %v973_v32  ;;  %v2017_v32 = vld [vmem:[#allocation5 + $0xd0] ss:$8 sps:$4 sm:$0xff]  }
  0x76   :  { %1273 = vmatpush1.bf16.msra.mxu1 %v1954_v35  ;;  %v2020_v35 = vld [vmem:[#allocation5 + $0xe0] ss:$8 sps:$4 sm:$0xff]  }
  0x77   :  { %804 = vmatpush1.bf16.msra.mxu0 %v1903_v20  ;;  %1274 = vmatprep.subr.bf16.mxu1 %v1962_v36  ;;  %v1999_v20 = vld [vmem:[#allocation5 + $0x170] ss:$8 sps:$4 sm:$0xff]   ;;  %v2025_v36 = vld [vmem:[#allocation5 + $0xf4] ss:$8 sps:$4 sm:$0xff]  }
  0x78   :  { %805 = vmatprep.subr.bf16.mxu0 %v1910_v22  ;;  %v2002_v22 = vld [vmem:[#allocation5 + $0x80] ss:$8 sps:$4 sm:$0xff]  }
  0x7a   :  { %1275 = vmatpush1.bf16.msra.mxu1 %v1960_v39 }
  0x7b   :  { %806 = vmatpush1.bf16.msra.mxu0 %v1908_v27  ;;  %1276 = vmatprep.subr.bf16.mxu1 %v1968_v40  ;;  %v2013_v27 = vld [vmem:[#allocation5 + $0xb4] ss:$8 sps:$4 sm:$0xff]  }
  0x7c   :  { %807 = vmatprep.subr.bf16.mxu0 %v1915_v29  ;;  %v2016_v29 = vld [vmem:[#allocation5 + $0xc4] ss:$8 sps:$4 sm:$0xff]  }
  0x7e   :  { %1277 = vmatpush1.bf16.msra.mxu1 %v1966_v42 }
  0x7f   :  { %808 = vmatpush1.bf16.msra.mxu0 %v1913_v31  ;;  %1278 = vmatprep.subr.bf16.mxu1 %v1974_v44  ;;  %v2019_v31 = vld [vmem:[#allocation5 + $0xd4] ss:$8 sps:$4 sm:$0xff]  }
  0x80   :  { %809 = vmatprep.subr.bf16.mxu0 %v1920_v33  ;;  %v2022_v33 = vld [vmem:[#allocation5 + $0xe4] ss:$8 sps:$4 sm:$0xff]   ;;  %v198_v44 = vld [vmem:[%s2278_s3] sm:$0x7] }
  0x82   :  { %1279 = vmatpush1.bf16.msra.mxu1 %v1972_v46 }
  0x83   :  { %810 = vmatpush1.bf16.msra.mxu0 %v1918_v37  ;;  %1280 = vmatprep.subr.bf16.mxu1 %v1980_v48  ;;  %v2023_v37 = vld [vmem:[#allocation5 + $0xf0] ss:$8 sps:$4 sm:$0xff]  }
  0x84   :  { %811 = vmatprep.subr.bf16.mxu0 %v1925_v38 }
  0x86   :  { %1281 = vmatpush1.bf16.msra.mxu1 %v1978_v50 }
  0x87   :  { %812 = vmatpush1.bf16.msra.mxu0 %v1923_v41  ;;  %1282 = vmatprep.subr.bf16.mxu1 %v1986_v5 }
  0x88   :  { %813 = vmatprep.subr.bf16.mxu0 %v1930_v43  ;;  %v210_v43 = vsub.s32 2, %v2185_v34 }
  0x8a   :  { %1283 = vmatpush1.bf16.msra.mxu1 %v1984_v4 }
  0x8b   :  { %814 = vmatpush1.bf16.msra.mxu0 %v1928_v45  ;;  %1284 = vmatprep.subr.bf16.mxu1 %v1992_v14  ;;  %v211_v45 = vrot.slane %v198_v44, %v210_v43  ;;  %v2032_v14 = vld [vmem:[%s2282_s7 + $0x58] sm:$0xff]  }
  0x8c   :  { %815 = vmatprep.subr.bf16.mxu0 %v1933_v47 }
  0x8e   :  { %1285 = vmatpush1.bf16.msra.mxu1 %v1990_v13  ;;  %v2031_v13 = vld [vmem:[%s2282_s7 + $0x10] sm:$0xff]  }
  0x8f   :  { %816 = vmatpush1.bf16.msra.mxu0 %v1931_v49  ;;  %1286 = vmatprep.subr.bf16.mxu1 %v1998_v17  ;;  %v2035_v17 = vld [vmem:[%s2282_s7 + $0x20] sm:$0xff]  }
  0x90   :  { %817 = vmatprep.subr.bf16.mxu0 %v1936_v51 }
  0x93   :  { %818 = vmatpush1.bf16.msra.mxu0 %v1934_v52 }
  0x94   :  { %819 = vmatprep.subr.bf16.mxu0 %v1939_v53 }
  0x97   :  { %820 = vmatpush1.bf16.msra.mxu0 %v1937_v54 }
  0x98   :  { %821 = vmatprep.subr.bf16.mxu0 %v1942_v55 }
  0x9b   :  { %822 = vmatpush1.bf16.msra.mxu0 %v1940_v56 }
  0x9c   :  { %823 = vmatprep.subr.bf16.mxu0 %v1945_v57 }
  0x9f   :  { %824 = vmatpush1.bf16.msra.mxu0 %v1943_v58 }
  0xa0   :  { %825 = vmatprep.subr.bf16.mxu0 %v1948_v59  ;;  %v202_v59 = vsub.s32 0, %v2185_v34 }
  0xa3   :  { %826 = vmatpush1.bf16.msra.mxu0 %v1946_v60  ;;  %v206_v60 = vsub.s32 1, %v2185_v34  ;;  %v2027_v34 = vld [vmem:[%s2282_s7] sm:$0xff]  }
  0xa4   :  { %827 = vmatprep.subr.bf16.mxu0 %v1951_v61  ;;  %v203_v61 = vrot.slane %v198_v44, %v202_v59 }
  0xa7   :  { %828 = vmatpush1.bf16.msra.mxu0 %v1949_v62  ;;  %v207_v62 = vrot.slane %v198_v44, %v206_v60 }
  0xa8   :  { %1313 = vmatprep.subr.bf16.mxu0 %v1959_v63 }
  0xaa   :  { %830 = vmatmul.mubr.bf16.vlgmr.msra.gmra.mrb[0].mxu0 %v2197_v19  ;;  %v1996_v19 = vld [vmem:[#allocation5 + $0x70] ss:$8 sps:$4 sm:$0xff]  }
  0xab   :  { %1314 = vmatpush1.bf16.msra.mxu0 %v1957_v0  ;;  %1345 = vmatprep.mubr.bf16.mxu0 %v2097_v30  ;;  %v2014_v30 = vld [vmem:[#allocation5 + $0xc0] ss:$8 sps:$4 sm:$0xff]  }
  0xac   :  { %1315 = vmatprep.subr.bf16.mxu0 %v1965_v1  ;;  %1287 = vmatpush1.bf16.msra.mxu1 %v1996_v19  ;;  %v2037_v19 = vld [vmem:[%s2282_s7 + $0x28] sm:$0xff]  }
  0xad   :  { %1288 = vmatprep.subr.bf16.mxu1 %v2004_v21  ;;  %v2039_v21 = vld [vmem:[%s2282_s7 + $0x30] sm:$0xff]  }
  0xaf   :  { %1316 = vmatpush1.bf16.msra.mxu0 %v1963_v2 }
  0xb0   :  { %1317 = vmatprep.subr.bf16.mxu0 %v1971_v3  ;;  %1289 = vmatpush1.bf16.msra.mxu1 %v2002_v22  ;;  %v2040_v22 = vld [vmem:[%s2282_s7 + $0x78] sm:$0xff]  }
  0xb1   :  { %1290 = vmatprep.subr.bf16.mxu1 %v2007_v23  ;;  %v2041_v23 = vld [vmem:[%s2282_s7 + $0x38] sm:$0xff]  }
  0xb3   :  { %1318 = vmatpush1.bf16.msra.mxu0 %v1969_v6 }
  0xb4   :  { %1319 = vmatprep.subr.bf16.mxu0 %v1977_v7  ;;  %1291 = vmatpush1.bf16.msra.mxu1 %v2005_v24 }
  0xb5   :  { %1292 = vmatprep.subr.bf16.mxu1 %v2010_v25 }
  0xb7   :  { %1320 = vmatpush1.bf16.msra.mxu0 %v1975_v8 }
  0xb8   :  { %1321 = vmatprep.subr.bf16.mxu0 %v1983_v9  ;;  %1293 = vmatpush1.bf16.msra.mxu1 %v2008_v26  ;;  %v2026_v9 = vld [vmem:[%s2282_s7 + $0x40] sm:$0xff]  }
  0xb9   :  { %1294 = vmatprep.subr.bf16.mxu1 %v2013_v27 }
  0xbb   :  { %1322 = vmatpush1.bf16.msra.mxu0 %v1981_v10  ;;  %v2028_v10 = vld [vmem:[%s2282_s7 + $0x48] sm:$0xff]  }
  0xbc   :  { %1323 = vmatprep.subr.bf16.mxu0 %v1989_v11  ;;  %1295 = vmatpush1.bf16.msra.mxu1 %v2011_v28  ;;  %v2029_v11 = vld [vmem:[%s2282_s7 + $0x8] sm:$0xff]   ;;  %v1354_v28 = vld [vmem:[%s2281_s6] sm:$0x3] }
  0xbd   :  { %1296 = vmatprep.subr.bf16.mxu1 %v2016_v29 }
  0xbf   :  { %1324 = vmatpush1.bf16.msra.mxu0 %v1987_v12  ;;  %v2030_v12 = vld [vmem:[%s2282_s7 + $0x50] sm:$0xff]  }
  0xc0   :  { %1325 = vmatprep.subr.bf16.mxu0 %v1995_v16  ;;  %1297 = vmatpush1.bf16.msra.mxu1 %v2014_v30  ;;  %v2034_v16 = vld [vmem:[%s2282_s7 + $0x60] sm:$0xff]  }
  0xc1   :  { %1298 = vmatprep.subr.bf16.mxu1 %v2019_v31  ;;  %v1359_v31 = vrot.slane %v1354_v28, %v202_v59 }
  0xc3   :  { %1326 = vmatpush1.bf16.msra.mxu0 %v1993_v15  ;;  %v2033_v15 = vld [vmem:[%s2282_s7 + $0x18] sm:$0xff]  }
  0xc4   :  { %1327 = vmatprep.subr.bf16.mxu0 %v2001_v18  ;;  %1299 = vmatpush1.bf16.msra.mxu1 %v2017_v32  ;;  %v2036_v18 = vld [vmem:[%s2282_s7 + $0x68] sm:$0xff]  }
  0xc5   :  { %1300 = vmatprep.subr.bf16.mxu1 %v2022_v33 }
  0xc7   :  { %1328 = vmatpush1.bf16.msra.mxu0 %v1999_v20  ;;  %v2038_v20 = vld [vmem:[%s2282_s7 + $0x70] sm:$0xff]  }
  0xc8   :  { %1301 = vmatpush1.bf16.msra.mxu1 %v2020_v35  ;;  %v1363_v35 = vrot.slane %v1354_v28, %v206_v60 }
  0xc9   :  { %1302 = vmatprep.subr.bf16.mxu1 %v2025_v36 }
  0xcc   :  { %1303 = vmatpush1.bf16.msra.mxu1 %v2023_v37 }
  0xcd   :  { %1788 = vmatprep.subr.bf16.mxu1 %v2026_v9 }
 0x120   :  { %v1760_v38 = vpop.f32.mrb[0].mxu1 }
 0x121   :  { %v1761_v39 = vpop.f32.mrb[1].mxu1 }
 0x122   :  { %v1762_v40 = vadd.f32 %v1761_v39, %v1760_v38  ;;  %v1763_v41 = vpop.f32.mrb[2].mxu1 }
 0x123   :  { %v1764_v42 = vpop.f32.mrb[3].mxu1 }
 0x124   :  { %v873_v46 = vadd.f32 %v1762_v40, %v211_v45 }
 0x140   :  { %v1782_v47 = vpop.f32.mrb[4].mxu1 }
 0x141   :  { %v1783_v48 = vpop.f32.mrb[5].mxu1 }
 0x142   :  { %v1784_v49 = vadd.f32 %v1783_v48, %v1782_v47  ;;  %v1785_v50 = vpop.f32.mrb[6].mxu1  ;;  %v1725_v47 = vld [vmem:[%s2283_s8] ss:$0 sm:$0xff] }
 0x143   :  { %v1786_v51 = vpop.f32.mrb[7].mxu1 }
 0x144   :  { %v913_v52 = vadd.f32 %v1784_v49, %v873_v46 }
 0x146   :  { %v920_v53 = vmax.f32 %v913_v52, 0.0 }
 0x148   :  { %v923_v54 = vpack.c.bf16 %v920_v53, %v920_v53  ;;  %v1025_v55 = vpop.f32.mrb[8].mxu1  ;;  %v1742_v53 = vld [vmem:[%s2284_s9] ss:$0 sm:$0xff] }
 0x149   :  { %v1027_v56 = vpop.f32.mrb[9].mxu1 }
 0x14a   :  { %1346 = vmatmul.mubr.bf16.vlgmr.msra.gmra.mrb[4].mxu0 %v923_v54  ;;  %v1029_v57 = vpop.f32.mrb[10].mxu1 }
 0x14b   :  { %v1030_v58 = vpop.f32.mrb[11].mxu1  ;;  %v1743_v57 = vld [vmem:[#allocation2] ss:$0 sm:$0xff] }
 0x17d   :  { %v831_v63 = vpop.f32.mrb[0].mxu0 }
 0x17e   :  { %v1810_v0 = vadd.f32 %v831_v63, %v203_v61  ;;  %v833_v1 = vpop.f32.mrb[1].mxu0 }
 0x17f   :  { %v1811_v2 = vadd.f32 %v833_v1, %v207_v62  ;;  %v835_v3 = vpop.f32.mrb[2].mxu0 }
 0x180   :  { %v918_v4 = vmax.f32 %v1810_v0, 0.0  ;;  %v836_v5 = vpop.f32.mrb[3].mxu0 }
 0x181   :  { %v919_v6 = vmax.f32 %v1811_v2, 0.0 }
 0x182   :  { %v921_v8 = vpack.c.bf16 %v918_v4, %v918_v4 }
 0x183   :  { %v922_v7 = vpack.c.bf16 %v919_v6, %v919_v6 }
 0x185   :  { %1304 = vmatprep.mubr.bf16.mxu1 %v922_v7 }
 0x186   :  { %1305 = vmatmul.mubr.bf16.vlgmr.msra.gmra.mrb[12].mxu1 %v921_v8 }
 0x187   :  { %1789 = vmatpush3.bf16.msra.mxu1 %v2027_v34 }
 0x188   :  { %1790 = vmatprep.subr.bf16.mxu1 %v2028_v10 }
 0x18b   :  { %1791 = vmatpush3.bf16.msra.mxu1 %v2029_v11 }
 0x18c   :  { %1792 = vmatprep.subr.bf16.mxu1 %v2030_v12 }
 0x18f   :  { %1793 = vmatpush3.bf16.msra.mxu1 %v2031_v13 }
 0x190   :  { %1794 = vmatprep.subr.bf16.mxu1 %v2032_v14 }
 0x193   :  { %1795 = vmatpush3.bf16.msra.mxu1 %v2033_v15 }
 0x194   :  { %1796 = vmatprep.subr.bf16.mxu1 %v2034_v16 }
 0x197   :  { %1797 = vmatpush3.bf16.msra.mxu1 %v2035_v17 }
 0x198   :  { %1798 = vmatprep.subr.bf16.mxu1 %v2036_v18 }
 0x19b   :  { %1799 = vmatpush3.bf16.msra.mxu1 %v2037_v19 }
 0x19c   :  { %1800 = vmatprep.subr.bf16.mxu1 %v2038_v20 }
 0x19f   :  { %1801 = vmatpush3.bf16.msra.mxu1 %v2039_v21 }
 0x1a0   :  { %1802 = vmatprep.subr.bf16.mxu1 %v2040_v22 }
 0x1a3   :  { %1803 = vmatpush3.bf16.msra.mxu1 %v2041_v23 }
 0x21d   :  { %v1347_v24 = vpop.f32.mrb[4].mxu0 }
 0x21e   :  { %v1349_v25 = vpop.f32.mrb[5].mxu0 }
 0x21f   :  { %v1351_v26 = vpop.f32.mrb[6].mxu0 }
 0x220   :  { %v1352_v27 = vpop.f32.mrb[7].mxu0 }
 0x259   :  { %v1306_v29 = vpop.f32.mrb[12].mxu1 }
 0x25a   :  { %v1307_v30 = vadd.f32 %v1306_v29, %v1025_v55  ;;  %v1308_v32 = vpop.f32.mrb[13].mxu1 }
 0x25b   :  { %v1309_v33 = vadd.f32 %v1308_v32, %v1027_v56  ;;  %v1310_v36 = vpop.f32.mrb[14].mxu1 }
 0x25c   :  { %v1348_v37 = vadd.f32 %v1347_v24, %v1307_v30  ;;  %v1311_v38 = vpop.f32.mrb[15].mxu1 }
 0x25d   :  { %v1350_v39 = vadd.f32 %v1349_v25, %v1309_v33 }
 0x25e   :  { %v1366_v40 = vadd.f32 %v1359_v31, %v1348_v37 }
 0x25f   :  { %v1367_v41 = vadd.f32 %v1363_v35, %v1350_v39 }
 0x260   :  { %v1368_v42 = vmax.f32 %v1366_v40, 0.0 }
 0x261   :  { %v1369_v43 = vmax.f32 %v1367_v41, 0.0 }
 0x262   :  { %v1370_v45 = vpack.c.bf16 %v1368_v42, %v1368_v42 }
 0x263   :  { %v1371_v44 = vpack.c.bf16 %v1369_v43, %v1369_v43 }
 0x265   :  { %1539 = vmatprep.mubr.bf16.mxu1 %v1371_v44 }
 0x266   :  { %1540 = vmatmul.mubr.bf16.vlgmr.msra.gmra.mrb[16].mxu1 %v1370_v45 }
 0x339   :  { %v1804_v46 = vpop.f32.mrb[16].mxu1 }
 0x33a   :  { %v1805_v48 = vpop.f32.mrb[17].mxu1 }
 0x33b   :  { %v1806_v49 = vadd.f32 %v1805_v48, %v1804_v46  ;;  %v1807_v50 = vpop.f32.mrb[18].mxu1 }
 0x33c   :  { %v1808_v51 = vpop.f32.mrb[19].mxu1 }
 0x33d   :  { %v1542_v52 = vadd.f32 %v1806_v49, %v1725_v47 }
 0x33f   :  { %v1547_v54 = vmax.f32 %v1542_v52, 0.0 }
 0x341   :  { %v1555_v55 = vmul.f32 %v1742_v53, %v1547_v54 }
 0x343   :  { %v1557_v56 = vsel %vm1556_vm2, %v1555_v55, 0.0 }
 0x344   :  { %1558 = vadd.xlane.f32.xlu0 %v1557_v56 }
 0x3d1   :  { %v1559_v58 = vpop.xlane.xlu0 %1558 }
 0x3d2   :  { %v1567_v59 = vadd.f32 %v1743_v57, %v1559_v58 }
 0x3d4   :  { %1569 = vst.msk [vmem:[%s2286_s11] sm:$0x3] %vm1568_vm3, %v1567_v59 }
 0x3d5   :  { %1574 = vsyncpa [#allocation4], 1 }
 0x3d6   :  { %1575 = vsyncpa [#allocation6], 1 }

</bundles_post_ra>
